<compile_context>
chip_gen: v6e
topology: v6e:2x2x1
jax: 0.10.0
libtpu: 0.0.40
codegen_flags: <defaults>
</compile_context>

<pallas_src>
import math

import jax
import jax.numpy as jnp
import numpy as np
from jax import lax
from jax.experimental import pallas as pl
from jax.experimental.pallas import tpu as pltpu


# ----------------------------------------------------------------------------- utils
def _tpu_generation():
    """Best-effort TPU generation string ('v5', 'v6', 'v7', ...) or None."""
    try:
        kind = jax.devices()[0].device_kind.lower()
    except Exception:  # pragma: no cover - defensive
        return None
    for g in ("v7", "v6", "v5", "v4", "v3", "v2"):
        if g in kind:
            return g
    return None


def _footprint(bb, tq, T, H, enc_bytes):
    """Conservative double-buffered VMEM footprint of one pipeline step (bytes)."""
    enc = bb * tq * T * H * enc_bytes          # encoder block (dominant)
    hp = bb * tq * H * 4                       # f32 hidden-projection block
    out = bb * tq * T * 4                      # f32 output block
    msk = tq * T * 4                           # f32 mask block
    const = H * H * 2 + H * 4                  # We^T (bf16) + v
    return 2 * (enc + hp + out + msk + const)  # x2: double-buffered pipeline


def _pick_tiles(B, T, H, enc_bytes, budget_bytes):
    """Pick (batch block, query tile) under the VMEM budget, keeping >=2 grid steps."""
    bb, tq = B, T
    # Shrink the batch block first (keeps softmax exact; j is never split across steps).
    while bb > 1 and _footprint(bb, tq, T, H, enc_bytes) > budget_bytes:
        bb -= 1
        while bb > 1 and B % bb:
            bb -= 1
    # Then shrink the query tile, keeping it (8,*)-friendly and evenly dividing T.
    while (tq > 8 and tq % 2 == 0 and (tq // 2) % 8 == 0 and T % (tq // 2) == 0
           and _footprint(bb, tq, T, H, enc_bytes) > budget_bytes):
        tq //= 2
    # Never collapse to a single fat grid step: keep >=2 (prefer 4) parallel steps so
    # both v7x TensorCores get work and the DMA pipeline has a next block to prefetch.
    target = min(4, B * max(1, T // tq))
    while bb > 1 and (B // bb) * (T // tq) < target:
        bb -= 1
        while bb > 1 and B % bb:
            bb -= 1
    return bb, tq


def _pick_chunk(bb, tq, T, H, cd_bytes, budget_bytes=4 << 20):
    """Query-chunk size for the in-kernel loop: keep compute intermediates small."""
    def inter(qc):
        # f32 eproj/pre + compute-dtype energy/product + small f32 score/softmax rows
        return bb * qc * T * H * (4 + 2 * cd_bytes) + 3 * bb * qc * T * 4

    qc = tq
    while qc % 2 == 0 and (qc // 2) % 8 == 0 and inter(qc) > budget_bytes:
        qc //= 2
    return qc


def _hint(x, m):
    """pl.multiple_of for traced values; pass-through for static Python ints."""
    return x if isinstance(x, int) else pl.multiple_of(x, m)


# ---------------------------------------------------------------------------- kernel
def _make_attn_kernel(bb, tq, T, H, qc, compute_dtype):
    nchunks = tq // qc

    def kernel(hproj_ref, enc_ref, mask_ref, we_ref, v_ref, o_ref):
        # hproj_ref: (bb, tq, H)    f32       hidden @ Wh^T + bias (precomputed)
        # enc_ref  : (bb, tq*T, H)  f32/bf16  encoder rows for this (batch, query) tile
        # mask_ref : (tq, T)        f32       mask rows for this query tile
        # we_ref   : (H, H)         bf16      We^T
        # v_ref    : (1, H)         f32       scoring vector
        # o_ref    : (bb, tq, T)    f32       softmax over j
        we = we_ref[...]                                   # hoisted: loaded once
        v_cd = v_ref[...].astype(compute_dtype)            # (1, H)

        def process(i0, r0):
            # Encoder rows for queries [i0, i0+qc): cast to bf16 right before the dot
            # (no wrapper-side cast pass over HBM).
            enc_blk = enc_ref[:, pl.ds(r0, qc * T), :]     # (bb, qc*T, H)
            enc_bf = enc_blk.astype(jnp.bfloat16).reshape(bb * qc * T, H)
            # MXU: bf16 x bf16 with f32 accumulation.
            eproj = jnp.dot(enc_bf, we, preferred_element_type=jnp.float32)

            hp = hproj_ref[:, pl.ds(i0, qc), :]            # (bb, qc, H) f32
            pre = eproj.reshape(bb, qc, T, H) + hp[:, :, None, :]
            # EUP tanh in bf16 on v6e/v7x (f32 on v5e and older).
            energy = jnp.tanh(pre.astype(compute_dtype))
            # v-score: VPU multiply + lane reduce, accumulated in f32.
            scores = jnp.sum((energy * v_cd).astype(jnp.float32), axis=-1)  # (bb,qc,T)

            # Torch-style trailing-dim broadcast: masked[b,i,j] = s[b,i,j] * mask[i,j].
            masked = scores * mask_ref[pl.ds(i0, qc), :][None, :, :]

            # Softmax over j (all of j is resident in this chunk -> plain softmax).
            m = jnp.max(masked, axis=-1, keepdims=True)
            e = jnp.exp(masked - m)
            denom = jnp.sum(e, axis=-1, keepdims=True)
            o_ref[:, pl.ds(i0, qc), :] = (
                e * pl.reciprocal(denom, approx=True)).astype(o_ref.dtype)

        if nchunks == 1:
            process(0, 0)
        else:
            def body(c, carry):
                process(_hint(c * qc, qc), _hint(c * (qc * T), qc * T))
                return carry
            lax.fori_loop(0, nchunks, body, 0, unroll=nchunks <= 4)

    return kernel


# --------------------------------------------------------------------------- wrapper
def attn_forward(hidden, encoder_outputs, mask, W, bias, v, *,
                 vmem_budget_bytes=None, vmem_limit_bytes=None):
    """Pallas equivalent of Attn.forward.

    hidden: (B,T,H), encoder_outputs: (B,T,T,H), mask: (B,T)
    W: (H, 2H) Linear weight, bias: (H,), v: (H,)
    returns: (B,T,T) float32
    """
    B, T, H = hidden.shape
    assert encoder_outputs.shape == (B, T, T, H)
    assert mask.shape == (B, T) and B == T, (
        "The module's `energies * mask` broadcast requires B == T.")

    gen = _tpu_generation()
    # bf16 energy path only where VPU/EUP are bf16-native (v6e/v7x); f32 elsewhere.
    compute_dtype = jnp.bfloat16 if gen in ("v6", "v7") else jnp.float32
    if vmem_budget_bytes is None:
        vmem_budget_bytes = {"v5": 8 << 20, "v6": 16 << 20,
                             "v7": 16 << 20}.get(gen, 10 << 20)

    hidden = jnp.asarray(hidden, jnp.float32)
    mask = jnp.asarray(mask, jnp.float32)
    W = jnp.asarray(W, jnp.float32)
    bias = jnp.asarray(bias, jnp.float32)
    v = jnp.asarray(v, jnp.float32)
    enc = jnp.asarray(encoder_outputs)
    if enc.dtype not in (jnp.float32, jnp.bfloat16):
        enc = enc.astype(jnp.float32)

    # Hoist the (cheap) hidden projection + bias into plain XLA.
    hproj = hidden @ W[:, :H].T + bias                      # (B, T, H) f32
    we_t = W[:, H:].T.astype(jnp.bfloat16)                  # (H, H)   bf16
    # Leading-dim merge only (free); NO dtype cast here (done per-block in-kernel).
    enc_flat = enc.reshape(B, T * T, H)                     # (B, T*T, H)
    v_row = v.reshape(1, H)

    enc_bytes = jnp.dtype(enc_flat.dtype).itemsize
    bb, tq = _pick_tiles(B, T, H, enc_bytes, vmem_budget_bytes)
    qc = _pick_chunk(bb, tq, T, H, jnp.dtype(compute_dtype).itemsize)

    # Fallback: if even the minimum tile exceeds the budget, raise the scoped VMEM
    # limit ourselves (capped per generation; v7x only has 64 MiB physical per TC).
    fp = _footprint(bb, tq, T, H, enc_bytes)
    if vmem_limit_bytes is None and fp > vmem_budget_bytes:
        cap = {"v5": 96 << 20, "v6": 100 << 20, "v7": 48 << 20}.get(gen, 48 << 20)
        vmem_limit_bytes = int(min(max(int(fp * 1.5), 32 << 20), cap))

    grid = (B // bb, T // tq)
    kernel = _make_attn_kernel(bb, tq, T, H, qc, compute_dtype)

    grid_spec = pltpu.PrefetchScalarGridSpec(
        num_scalar_prefetch=0,
        grid=grid,
        in_specs=[
            pl.BlockSpec((bb, tq, H), lambda b, i: (b, i, 0)),        # hproj
            pl.BlockSpec((bb, tq * T, H), lambda b, i: (b, i, 0)),    # encoder (j flat)
            pl.BlockSpec((tq, T), lambda b, i: (i, 0)),               # mask rows
            pl.BlockSpec((H, H), lambda b, i: (0, 0)),                # We^T
            pl.BlockSpec((1, H), lambda b, i: (0, 0)),                # v
        ],
        out_specs=pl.BlockSpec((bb, tq, T), lambda b, i: (b, i, 0)),
    )

    return pl.pallas_call(
        kernel,
        out_shape=jax.ShapeDtypeStruct((B, T, T), jnp.float32),
        grid_spec=grid_spec,
        compiler_params=pltpu.CompilerParams(
            dimension_semantics=("parallel", "parallel"),
            vmem_limit_bytes=vmem_limit_bytes,
        ),
    )(hproj, enc_flat, mask, we_t, v_row)


def attn_reference(hidden, encoder_outputs, mask, W, bias, v):
    """Pure-JAX reference mirroring the PyTorch forward exactly (f32)."""
    B, T, H = hidden.shape
    Hrep = jnp.broadcast_to(hidden[:, :, None, :], (B, T, T, H))
    cat = jnp.concatenate([Hrep, encoder_outputs], axis=-1)   # (B,T,T,2H)
    energy = jnp.tanh(cat @ W.T + bias)                       # (B,T,T,H)
    scores = energy @ v                                       # (B,T,T)
    masked = scores * mask                                    # torch-style broadcast
    return jax.nn.softmax(masked, axis=2)


if __name__ == "__main__":
    # Small shapes; B == T is required by the module's own mask broadcast.
    B, T, H = 8, 8, 32
    concat_size = 2 * H  # Linear input = [hidden | encoder] along feature dim

    key = jax.random.PRNGKey(0)
    k_hid, k_enc, k_mask, k_w, k_b, k_v = jax.random.split(key, 6)

    hidden = jax.random.normal(k_hid, (B, T, H), dtype=jnp.float32)
    encoder_outputs = jax.random.normal(k_enc, (B, T, T, H), dtype=jnp.float32)
    mask = jax.random.bernoulli(k_mask, p=0.7, shape=(B, T)).astype(jnp.float32)

    lim = 1.0 / math.sqrt(concat_size)
    W = jax.random.uniform(k_w, (H, concat_size), jnp.float32, -lim, lim)
    bias = jax.random.uniform(k_b, (H,), jnp.float32, -lim, lim)
    v = jax.random.normal(k_v, (H,), jnp.float32) * (1.0 / math.sqrt(H))

    out = jax.block_until_ready(attn_forward(hidden, encoder_outputs, mask, W, bias, v))

    # Check against the exact f32 reference; tolerances depend on whether the chip
    # runs the bf16 energy path (v6e/v7x) or the f32 path (v5e and older).
    ref = jax.block_until_ready(attn_reference(hidden, encoder_outputs, mask, W, bias, v))
    if _tpu_generation() in ("v6", "v7"):
        tol = dict(rtol=2e-2, atol=2e-2)   # bf16 enc/We/tanh path
    else:
        tol = dict(rtol=1e-2, atol=5e-3)   # bf16 enc/We only, f32 tanh path
    np.testing.assert_allclose(np.asarray(out), np.asarray(ref), **tol)

    # Softmax rows should sum to ~1 (approx reciprocal adds ~1e-3 relative error).
    np.testing.assert_allclose(np.asarray(out).sum(-1), 1.0, rtol=0, atol=5e-3)

    assert out.shape == (B, T, T) and out.dtype == jnp.float32
    # TODO(synk): module multiplies the 0/1 mask into energies BEFORE softmax
    # (exp(0)=1), so masked positions still get weight; reproduced faithfully here.
    print("KERNEL_OK")
</pallas_src>

<mosaic_0001>
module attributes {stable_mosaic.version = 11 : i64} {
  func.func @kernel(%arg0: i32, %arg1: i32, %arg2: memref<2x8x32xf32, #tpu.memory_space<vmem>>, %arg3: memref<2x64x32xf32, #tpu.memory_space<vmem>>, %arg4: memref<8x8xf32, #tpu.memory_space<vmem>>, %arg5: memref<32x32xbf16, #tpu.memory_space<vmem>>, %arg6: memref<1x32xf32, #tpu.memory_space<vmem>>, %arg7: memref<2x8x8xf32, #tpu.memory_space<vmem>>) attributes {dimension_semantics = [#tpu.dimension_semantics<parallel>, #tpu.dimension_semantics<parallel>], iteration_bounds = array<i64: 4, 1>, scalar_prefetch = 0 : i64, scratch_operands = 0 : i64, tpu.core_type = #tpu.core_type<tc>, window_params = [{transform_indices = @transform_0, window_bounds = array<i64: 2, 8, 32>}, {transform_indices = @transform_1, window_bounds = array<i64: 2, 64, 32>}, {transform_indices = @transform_2, window_bounds = array<i64: 8, 8>}, {pipeline_mode = #tpu.pipeline_mode<synchronous>, transform_indices = @transform_3, window_bounds = array<i64: 32, 32>}, {pipeline_mode = #tpu.pipeline_mode<synchronous>, transform_indices = @transform_4, window_bounds = array<i64: 1, 32>}, {transform_indices = @transform_5, window_bounds = array<i64: 2, 8, 8>}]} {
    %c0 = arith.constant 0 : index
    %c0_0 = arith.constant 0 : index
    %0 = vector.load %arg5[%c0, %c0_0] : memref<32x32xbf16, #tpu.memory_space<vmem>>, vector<32x32xbf16>
    %c0_1 = arith.constant 0 : index
    %c0_2 = arith.constant 0 : index
    %1 = vector.load %arg6[%c0_1, %c0_2] : memref<1x32xf32, #tpu.memory_space<vmem>>, vector<1x32xf32>
    %c0_3 = arith.constant 0 : index
    %c0_4 = arith.constant 0 : index
    %c0_5 = arith.constant 0 : index
    %2 = vector.load %arg3[%c0_3, %c0_4, %c0_5] : memref<2x64x32xf32, #tpu.memory_space<vmem>>, vector<2x64x32xf32>
    %3 = arith.truncf %2 : vector<2x64x32xf32> to vector<2x64x32xbf16>
    %4 = vector.shape_cast %3 : vector<2x64x32xbf16> to vector<128x32xbf16>
    %cst = arith.constant dense<0.000000e+00> : vector<128x32xf32>
    %5 = tpu.matmul %4, %0, %cst {dimension_numbers = #tpu.dot_dimension_numbers<[1], [0], [0], [1], [0, 0, 1, 1], [], []>} : vector<128x32xbf16>, vector<32x32xbf16>, vector<128x32xf32> -> vector<128x32xf32>
    %c0_6 = arith.constant 0 : index
    %c0_7 = arith.constant 0 : index
    %c0_8 = arith.constant 0 : index
    %6 = vector.load %arg2[%c0_6, %c0_7, %c0_8] : memref<2x8x32xf32, #tpu.memory_space<vmem>>, vector<2x8x32xf32>
    %7 = vector.shape_cast %5 : vector<128x32xf32> to vector<2x8x8x32xf32>
    %8 = vector.shape_cast %6 : vector<2x8x32xf32> to vector<2x8x1x32xf32>
    %9 = vector.broadcast %8 : vector<2x8x1x32xf32> to vector<2x8x8x32xf32>
    %10 = arith.addf %7, %9 : vector<2x8x8x32xf32>
    %11 = math.tanh %10 : vector<2x8x8x32xf32>
    %12 = vector.shape_cast %1 : vector<1x32xf32> to vector<1x1x1x32xf32>
    %13 = vector.broadcast %12 : vector<1x1x1x32xf32> to vector<2x8x8x32xf32>
    %14 = arith.mulf %11, %13 : vector<2x8x8x32xf32>
    %cst_9 = arith.constant dense<0.000000e+00> : vector<2x8x8xf32>
    %15 = vector.multi_reduction <add>, %14, %cst_9 [3] : vector<2x8x8x32xf32> to vector<2x8x8xf32>
    %c0_10 = arith.constant 0 : index
    %c0_11 = arith.constant 0 : index
    %16 = vector.load %arg4[%c0_10, %c0_11] : memref<8x8xf32, #tpu.memory_space<vmem>>, vector<8x8xf32>
    %17 = vector.shape_cast %16 : vector<8x8xf32> to vector<1x8x8xf32>
    %18 = vector.broadcast %17 : vector<1x8x8xf32> to vector<2x8x8xf32>
    %19 = arith.mulf %15, %18 : vector<2x8x8xf32>
    %cst_12 = arith.constant dense<0xFF800000> : vector<2x8xf32>
    %20 = vector.multi_reduction <maximumf>, %19, %cst_12 [2] : vector<2x8x8xf32> to vector<2x8xf32>
    %21 = vector.shape_cast %20 : vector<2x8xf32> to vector<2x8x1xf32>
    %22 = vector.broadcast %21 : vector<2x8x1xf32> to vector<2x8x8xf32>
    %23 = arith.subf %19, %22 : vector<2x8x8xf32>
    %24 = math.exp %23 : vector<2x8x8xf32>
    %cst_13 = arith.constant dense<0.000000e+00> : vector<2x8xf32>
    %25 = vector.multi_reduction <add>, %24, %cst_13 [2] : vector<2x8x8xf32> to vector<2x8xf32>
    %26 = vector.shape_cast %25 : vector<2x8xf32> to vector<2x8x1xf32>
    %27 = tpu.reciprocal %26 {approx = true} : vector<2x8x1xf32> -> vector<2x8x1xf32>
    %28 = vector.broadcast %27 : vector<2x8x1xf32> to vector<2x8x8xf32>
    %29 = arith.mulf %24, %28 : vector<2x8x8xf32>
    %c0_14 = arith.constant 0 : index
    %c0_15 = arith.constant 0 : index
    %c0_16 = arith.constant 0 : index
    %30 = vector.load %arg7[%c0_14, %c0_15, %c0_16] : memref<2x8x8xf32, #tpu.memory_space<vmem>>, vector<2x8x8xf32>
    tpu.vector_store %arg7[%c0_14, %c0_15, %c0_16], %29 {strides = array<i32>} : memref<2x8x8xf32, #tpu.memory_space<vmem>>, vector<2x8x8xf32>,
    return
  }
  func.func @transform_0(%arg0: i32, %arg1: i32) -> (i32, i32, i32) {
    %c0_i32 = arith.constant 0 : i32
    %c0_i32_0 = arith.constant 0 : i32
    return %arg0, %arg1, %c0_i32 : i32, i32, i32
  }
  func.func @transform_1(%arg0: i32, %arg1: i32) -> (i32, i32, i32) {
    %c0_i32 = arith.constant 0 : i32
    %c0_i32_0 = arith.constant 0 : i32
    return %arg0, %arg1, %c0_i32 : i32, i32, i32
  }
  func.func @transform_2(%arg0: i32, %arg1: i32) -> (i32, i32) {
    %c0_i32 = arith.constant 0 : i32
    %c0_i32_0 = arith.constant 0 : i32
    return %arg1, %c0_i32 : i32, i32
  }
  func.func @transform_3(%arg0: i32, %arg1: i32) -> (i32, i32) {
    %c0_i32 = arith.constant 0 : i32
    %c0_i32_0 = arith.constant 0 : i32
    %c0_i32_1 = arith.constant 0 : i32
    return %c0_i32, %c0_i32_0 : i32, i32
  }
  func.func @transform_4(%arg0: i32, %arg1: i32) -> (i32, i32) {
    %c0_i32 = arith.constant 0 : i32
    %c0_i32_0 = arith.constant 0 : i32
    %c0_i32_1 = arith.constant 0 : i32
    return %c0_i32, %c0_i32_0 : i32, i32
  }
  func.func @transform_5(%arg0: i32, %arg1: i32) -> (i32, i32, i32) {
    %c0_i32 = arith.constant 0 : i32
    %c0_i32_0 = arith.constant 0 : i32
    return %arg0, %arg1, %c0_i32 : i32, i32, i32
  }
}

</mosaic_0001>

<bundles_post_ra>
// kernel: tpu_custom_call.1
= control target key start
LH: loop header
LB: loop body
LE: loop exit
PB: predicated region body
PF: predicated region fallthrough
CT: control target
= control target key end

     0   :  { %10 = vsyncpa [#allocation3], 0  ;;  %s2496_s0 = inlined_call_operand.vmem [shape: f32[8,8,32], index: 0, kind: input, shape index: {}]   ;;  %s2497_s1 = inlined_call_operand.vmem [shape: f32[8,64,32], index: 1, kind: input, shape index: {}]   ;;  %s2498_s2 = inlined_call_operand.vmem [shape: f32[8,8], index: 2, kind: input, shape index: {}]   ;;  %s2499_s3 = inlined_call_operand.vmem [shape: bf16[32,32], index: 3, kind: input, shape index: {}]   ;;  %s2500_s4 = inlined_call_operand.vmem [shape: f32[1,32], index: 4, kind: input, shape index: {}]   ;;  %s2501_s5 = inlined_call_operand.hbm [shape: f32[8,8,8], index: 5, kind: output, shape index: {}]  }
   0x1   :  { %12 = vsyncpa [#allocation3 + $0x1], 0  ;;  %s1958_s18 = smov 0   ;;  %s1960_s19 = smov 0  }
   0x2   :  { %s1962_s20 = smov 0   ;;  %s1964_s21 = smov 0  }
   0x3   :  { %s1966_s22 = smov 0   ;;  %s1968_s23 = smov 0  }
   0x4 LB: > { %s1648_s24 = sadd.s32 4294967295, %s1921_s23   ;;  %s1649_s25 = sadd.s32 4294967294, %s1921_s23   ;;  %s1921_s23 = sphi %s1968_s23, %s18_s23   ;;  %s1917_s22 = sphi %s1966_s22, %s2508_s22   ;;  %s1913_s21 = sphi %s1964_s21, %s2507_s21   ;;  %s1909_s20 = sphi %s1962_s20, %s2506_s20   ;;  %s1905_s19 = sphi %s1960_s19, %s2505_s19   ;;  %s1901_s18 = sphi %s1958_s18, %s2504_s18  }
   0x5   : > { %s30_s26 = sadd.s32 1, %s1917_s22  ;;  %s163_s27 = sadd.s32 1, %s1909_s20 }
   0x6   : > { %p32_p0 = scmp.ge.s32.totalorder %s30_s26, 4  ;;  %p173_p1 = scmp.ne.s32.totalorder %s1909_s20, %s1905_s19 }
   0x7   : > { %p174_p2 = scmp.eq.s32.totalorder %s1648_s24, 3  ;;  %p179_p3 = scmp.ne.s32.totalorder %s1905_s19, %s1901_s18 }
   0x8   : > { %s2510_s26 = smov (%p32_p0, %s30_s26), 0  ;;  %p180_p5 = scmp.eq.s32.totalorder %s1649_s25, 3 }
   0x9   : > { %p1998_p4 = por %p174_p2, %p173_p1  ;;  %s158_s29 = ssub.s32 %s1917_s22, %s2510_s26 }
   0xa   : > { %p1653_p6 = scmp.ge.s32.totalorder %s1921_s23, 1  ;;  %p161_p7 = scmp.eq.s32.totalorder %s158_s29, 0 }
   0xb   : > { %p2005_p8 = por %p180_p5, %p179_p3  ;;  %p238_p9 = scmp.lt.s32.totalorder %s1921_s23, 5 }
   0xc   : > { %s2011_s6 = scalar_select %p161_p7, %s1909_s20, %s163_s27  }
   0xd   : > { %p239_p10 = pnand %p1653_p6, %p238_p9 }
   0xe   : > { %s1655_s9 = sshll.u32 (!%p239_p10), %s1913_s21, 1  ;;  %s1677_s13 = sshll.u32 (!%p239_p10), %s1913_s21, 8 }
   0xf   : > { %242 = sbr.rel (%p239_p10) target bundleno = 1193 (0x4a9), region = 40  ;;  %p284_p11 = scmp.lt.s32.totalorder (!%p239_p10), %s1655_s9, 7 }
  0x10   : > { %s2439_s15 = scalar_lea.hbm (!%p239_p10), %s2501_s5, %s1677_s13 }
  0x14   : > { %v1773_v0 = vld [vmem:[%s2499_s3 + $0x8] sm:$0xff]   ;;  %v481_v1 = vlaneseq  ;;  %v1774_v2 = vld [vmem:[%s2499_s3] sm:$0xff]   ;;  %s2512_s9 = smov (!%p284_p11, %s1655_s9), 7  ;;  %vm351_vm0 = vcmask 261120   ;;  %v1923_v41 = vmov 1966171168  }
  0x15   : > { %1688 = vmatprep.subr.bf16.mxu0 %v1773_v0  ;;  %1708 = vmatprep.subr.bf16.mxu1 %v1773_v0  ;;  %v2028_v4 = vld [vmem:[%s2498_s2] sm:$0xff]  ;;  %s1676_s14 = sshll.u32 %s2512_s9, 6  ;;  %v479_v42 = vunpack.c.l.s4 %v1923_v41  ;;  %s1656_s24 = sshll.u32 %s2512_s9, 3  ;;  %vm969_vm1 = vcmask 1041409   ;;  %vm971_vm2 = vcmask 1042434   ;;  %vm973_vm3 = vcmask 1043459  }
  0x16   : > { %v2021_v3 = vshrl.u32 %v481_v1, 7  ;;  %1689 = vmatpush3.bf16.msra.mxu0 %v1773_v0  ;;  %1710 = vmatpush3.bf16.msra.mxu1 %v1773_v0  ;;  %s2046_s17 = scalar_lea.vmem %s2497_s1, %s1676_s14  ;;  %s290_s29 = scalar_lea.vmem %s2496_s0, %s1656_s24  ;;  %vm975_vm4 = vcmask 1044484   ;;  %vm977_vm5 = vcmask 1045509   ;;  %vm979_vm6 = vcmask 1046534  }
  0x17   : > { %1690 = vmatprep.subr.bf16.mxu0 %v1774_v2  ;;  %1709 = vmatprep.subr.bf16.mxu1 %v1774_v2  ;;  %v315_v11 = vld [vmem:[%s2046_s17] sm:$0xff]  ;;  %v316_v12 = vld [vmem:[%s2046_s17 + $0x8] sm:$0xff]  ;;  %v317_v16 = vld [vmem:[%s2046_s17 + $0x10] sm:$0xff]  ;;  %v480_v43 = vunpack.c.0.s8 %v479_v42  ;;  %vm981_vm7 = vcmask 1047559   ;;  %vm992_vm8 = vcmask 64512   ;;  %s280_s9 = sand.u32 1, %s1905_s19  }
  0x18   : > { %v2031_v5 = vsub.s32 1, %v2021_v3  ;;  %v2034_v6 = vsub.s32 0, %v2021_v3  ;;  %v2037_v7 = vsub.s32 2, %v2021_v3  ;;  %v2041_v8 = vsub.s32 4, %v2021_v3  ;;  %v323_v13 = vld [vmem:[%s2046_s17 + $0x40] sm:$0xff]  ;;  %v324_v15 = vld [vmem:[%s2046_s17 + $0x48] sm:$0xff] }
  0x19   : > { %v331_v14 = vpack.c.bf16 %v316_v12, %v315_v11  ;;  %v318_v17 = vld [vmem:[%s2046_s17 + $0x18] sm:$0xff]  ;;  %v2061_v19 = vsub.s32 3, %v2021_v3  ;;  %v335_v20 = vpack.c.bf16 %v324_v15, %v323_v13  ;;  %v325_v22 = vld [vmem:[%s2046_s17 + $0x50] sm:$0xff]  ;;  %v319_v24 = vld [vmem:[%s2046_s17 + $0x20] sm:$0xff]  ;;  %v2080_v35 = vsub.s32 5, %v2021_v3  ;;  %s1654_s10 = sshll.u32 %s280_s9, 4 }
  0x1a   : > { %v769_v9 = vrot.slane %v2028_v4, %v2031_v5  ;;  %v762_v10 = vrot.slane %v2028_v4, %v2034_v6  ;;  %1691 = vmatpush3.bf16.msra.mxu0 %v1774_v2  ;;  %1711 = vmatpush3.bf16.msra.mxu1 %v1774_v2  ;;  %v776_v18 = vrot.slane %v2028_v4, %v2037_v7  ;;  %v326_v23 = vld [vmem:[%s2046_s17 + $0x58] sm:$0xff]  ;;  %v320_v27 = vld [vmem:[%s2046_s17 + $0x28] sm:$0xff]  ;;  %v327_v29 = vld [vmem:[%s2046_s17 + $0x60] sm:$0xff]  ;;  %s282_s11 = scalar_lea.vmem [#allocation2], %s1654_s10  ;;  %s2451_s16 = scalar_lea.sflag [#allocation3], %s280_s9 }
  0x1b   : > { %v332_v21 = vpack.c.bf16 %v318_v17, %v317_v16  ;;  %v790_v25 = vrot.slane %v2028_v4, %v2041_v8  ;;  %1692 = vmatprep.mubr.msk.bf16.mxu0 %vm351_vm0, %v331_v14  ;;  %v336_v26 = vpack.c.bf16 %v326_v23, %v325_v22  ;;  %1700 = vmatprep.mubr.msk.bf16.mxu1 %vm351_vm0, %v335_v20  ;;  %v328_v30 = vld [vmem:[%s2046_s17 + $0x68] sm:$0xff]  ;;  %v321_v31 = vld [vmem:[%s2046_s17 + $0x30] sm:$0xff]  ;;  %v322_v32 = vld [vmem:[%s2046_s17 + $0x38] sm:$0xff]  ;;  %s1540_s12 = sshll.u32 %s282_s11, 4  ;;  %s1925_s24 = smov [#allocation2]   ;;  %s2441_s12 = int_to_ptr.vmem [resolvable:$true] %s1540_s12 }
  0x1c   : > { %771 = vbcast.lane.b32.xlu1 %v769_v9, 256  ;;  %764 = vbcast.lane.b32.xlu0 %v762_v10, 256  ;;  %v333_v28 = vpack.c.bf16 %v320_v27, %v319_v24  ;;  %v337_v33 = vpack.c.bf16 %v328_v30, %v327_v29  ;;  %v783_v34 = vrot.slane %v2028_v4, %v2061_v19  ;;  %v329_v36 = vld [vmem:[%s2046_s17 + $0x70] sm:$0xff]  ;;  %v330_v37 = vld [vmem:[%s2046_s17 + $0x78] sm:$0xff]  ;;  %v473_v45 = vld [vmem:[%s290_s29] sm:$0xff]  ;;  %s1845_s17 = scalar_lea.vmem %s2441_s12, 256 }
  0x1d   : > { %1693 = vmatmul.mubr.msk.bf16.vlgmr.msra.gmra.mxu0 %vm351_vm0, %v332_v21  ;;  %1701 = vmatmul.mubr.msk.bf16.vlgmr.msra.gmra.mxu1 %vm351_vm0, %v336_v26  ;;  %v334_v38 = vpack.c.bf16 %v322_v32, %v321_v31  ;;  %v338_v39 = vpack.c.bf16 %v330_v37, %v329_v36  ;;  %v797_v40 = vrot.slane %v2028_v4, %v2080_v35  ;;  %v474_v46 = vld [vmem:[%s290_s29 + $0x8] sm:$0xff]  ;;  %p1846_p12 = scmp.ne.s32.totalorder %s2441_s12, %s1845_s17  ;;  %s1849_s25 = sshll.u32 %s1925_s24, 4  ;;  %s1850_s25 = int_to_ptr.vmem [resolvable:$false] %s1849_s25 }
  0x1e   : > { %1696 = vmatprep.mubr.msk.bf16.mxu0 %vm351_vm0, %v333_v28  ;;  %1704 = vmatprep.mubr.msk.bf16.mxu1 %vm351_vm0, %v337_v33  ;;  %v483_v44 = vsub.s32 %v480_v43, %v2021_v3  ;;  %v526_v53 = vcombine.high %v474_v46, %v474_v46  ;;  %v477_v54 = vcombine.high %v473_v45, %v473_v45  ;;  %s1851_s27 = scalar_lea.vmem %s1850_s25, 512  ;;  %p1852_p1 = scmp.lt.s32.totalorder %s2441_s12, %s1850_s25 }
  0x1f   : > { %p1847_p13 = pnand %p1846_p12, %p1998_p4  ;;  %p1853_p2 = scmp.lt.s32.totalorder %s1851_s27, %s1845_s17 }
  0x20   : > { %778 = vbcast.lane.b32.xlu1 %v776_v18, 256  ;;  %792 = vbcast.lane.b32.xlu0 %v790_v25, 256  ;;  %v484_v47 = vrot.slane %v473_v45, %v483_v44  ;;  %v533_v48 = vrot.slane %v474_v46, %v483_v44  ;;  %v540_v59 = vrot.slane %v526_v53, %v483_v44 }
  0x21   : > { %v491_v60 = vrot.slane %v477_v54, %v483_v44  ;;  %p1848_p0 = pneg %p1847_p13  ;;  %p1854_p3 = por %p1853_p2, %p1852_p1 }
  0x22   : > { %v500_v49 = vrot.slane %v484_v47, %v483_v44  ;;  %v492_v50 = vcombine.high %v484_v47, %v484_v47  ;;  %v549_v51 = vrot.slane %v533_v48, %v483_v44  ;;  %v541_v52 = vcombine.high %v533_v48, %v533_v48 }
  0x23   : > { %v507_v63 = vrot.slane %v491_v60, %v483_v44  ;;  %v556_v9 = vrot.slane %v540_v59, %v483_v44  ;;  %v542_v22 = vcombine.high %v540_v59, %v540_v59  ;;  %v493_v26 = vcombine.high %v491_v60, %v491_v60  ;;  %p1855_p5 = pnand %p1854_p3, %p1848_p0 }
  0x24   : > { %785 = vbcast.lane.b32.xlu1 %v783_v34, 256  ;;  %v522_v55 = vcombine.high %v500_v49, %v500_v49  ;;  %v514_v56 = vrot.slane %v492_v50, %v483_v44  ;;  %v571_v57 = vcombine.high %v549_v51, %v549_v51  ;;  %v563_v58 = vrot.slane %v541_v52, %v483_v44 }
  0x25   : > { %1697 = vmatmul.mubr.msk.bf16.gmra.mxu0 %vm351_vm0, %v334_v38  ;;  %1705 = vmatmul.mubr.msk.bf16.gmra.mxu1 %vm351_vm0, %v338_v39  ;;  %v578_v10 = vrot.slane %v500_v49, %v2034_v6  ;;  %v610_v12 = vrot.slane %v549_v51, %v2034_v6  ;;  %v523_v16 = vcombine.high %v507_v63, %v507_v63 }
  0x26   : > { %v586_v61 = vrot.slane %v522_v55, %v2034_v6  ;;  %v524_v62 = vcombine.high %v514_v56, %v514_v56  ;;  %v618_v0 = vrot.slane %v571_v57, %v2034_v6  ;;  %v573_v2 = vcombine.high %v563_v58, %v563_v58 }
  0x27   : > { %v572_v21 = vcombine.high %v556_v9, %v556_v9  ;;  %v582_v25 = vrot.slane %v514_v56, %v2034_v6  ;;  %v614_v29 = vrot.slane %v563_v58, %v2034_v6  ;;  %v602_v32 = vrot.slane %v523_v16, %v2034_v6 }
  0x28   : > { %799 = vbcast.lane.b32.xlu1 %v797_v40, 256  ;;  %v590_v15 = vrot.slane %v524_v62, %v2034_v6  ;;  %v622_v20 = vrot.slane %v573_v2, %v2034_v6  ;;  %v570_v37 = vrot.slane %v542_v22, %v483_v44  ;;  %v521_v40 = vrot.slane %v493_v26, %v483_v44  ;;  %v2110_v44 = vld [vmem:[%s2500_s4] ss:$0 sm:$0xff] }
  0x29   : > { %v634_v36 = vrot.slane %v572_v21, %v2034_v6  ;;  %v626_v47 = vrot.slane %v556_v9, %v2034_v6  ;;  %v594_v49 = vrot.slane %v507_v63, %v2034_v6 }
  0x2a   : > { %v574_v48 = vcombine.high %v570_v37, %v570_v37  ;;  %v525_v50 = vcombine.high %v521_v40, %v521_v40  ;;  %v630_v9 = vrot.slane %v570_v37, %v2034_v6 }
  0x2c   : > { %v638_v54 = vrot.slane %v574_v48, %v2034_v6  ;;  %v606_v56 = vrot.slane %v525_v50, %v2034_v6 }
  0xdd   : > { %v1694_v11 = vpop.f32.mrf.mxu0  ;;  %v1702_v14 = vpop.f32.mrf.mxu1 }
  0xde   : > { %v657_v13 = vadd.f32 %v1694_v11, %v586_v61  ;;  %v665_v17 = vadd.f32 %v1702_v14, %v618_v0  ;;  %v598_v61 = vrot.slane %v521_v40, %v2034_v6 }
  0xdf   : > { %v410_v18 = vpop.f32.mrf.mxu0  ;;  %v442_v24 = vpop.f32.mrf.mxu1 }
  0xe0   : > { %1777 = vtanh.f32 %v657_v13  ;;  %v655_v23 = vadd.f32 %v578_v10, %v410_v18  ;;  %v663_v28 = vadd.f32 %v610_v12, %v442_v24 }
  0xe1   : > { %1779 = vtanh.f32 %v665_v17  ;;  %v1695_v27 = vpop.f32.mrf.mxu0  ;;  %v1703_v31 = vpop.f32.mrf.mxu1 }
  0xe2   : > { %1781 = vtanh.f32 %v655_v23  ;;  %v658_v30 = vadd.f32 %v1695_v27, %v590_v15  ;;  %v666_v34 = vadd.f32 %v1703_v31, %v622_v20 }
  0xe3   : > { %1783 = vtanh.f32 %v663_v28  ;;  %v413_v33 = vpop.f32.mrf.mxu0  ;;  %v445_v39 = vpop.f32.mrf.mxu1 }
  0xe4   : > { %1785 = vtanh.f32 %v658_v30  ;;  %v656_v38 = vadd.f32 %v582_v25, %v413_v33  ;;  %v664_v42 = vadd.f32 %v614_v29, %v445_v39 }
  0xe5   : > { %1787 = vtanh.f32 %v666_v34  ;;  %v1698_v41 = vpop.f32.mrf.mxu0  ;;  %v1706_v45 = vpop.f32.mrf.mxu1 }
  0xe6   : > { %v661_v43 = vadd.f32 %v1698_v41, %v602_v32  ;;  %1789 = vtanh.f32 %v664_v42  ;;  %v669_v46 = vadd.f32 %v1706_v45, %v634_v36  ;;  %v1924_v42 = vmov 0  }
  0xe7   : > { %1791 = vtanh.f32 %v656_v38  ;;  %v458_v51 = vpop.f32.mrf.mxu1  ;;  %v426_v52 = vpop.f32.mrf.mxu0  ;;  %1771 = vset.pattern.permute.xlu1 %v1924_v42  ;;  %1772 = vset.pattern.permute.xlu0 %v1924_v42 }
  0xe8   : > { %1793 = vtanh.f32 %v661_v43  ;;  %v667_v53 = vadd.f32 %v626_v47, %v458_v51  ;;  %v659_v55 = vadd.f32 %v594_v49, %v426_v52 }
  0xe9   : > { %1795 = vtanh.f32 %v669_v46  ;;  %v1707_v57 = vpop.f32.mrf.mxu1  ;;  %v1699_v59 = vpop.f32.mrf.mxu0 }
  0xea   : > { %1797 = vtanh.f32 %v667_v53  ;;  %v670_v2 = vadd.f32 %v1707_v57, %v638_v54  ;;  %v662_v11 = vadd.f32 %v1699_v59, %v606_v56 }
  0xeb   : > { %1799 = vtanh.f32 %v659_v55  ;;  %v461_v14 = vpop.f32.mrf.mxu1  ;;  %v429_v16 = vpop.f32.mrf.mxu0 }
  0xec   : > { %1801 = vtanh.f32 %v670_v2  ;;  %v668_v22 = vadd.f32 %v630_v9, %v461_v14  ;;  %v660_v25 = vadd.f32 %v598_v61, %v429_v16  ;;  %v772_v2 = vpop.permute.xlu1 %771 }
  0xed   : > { %v1778_v58 = vpop.eup %1777  ;;  %1803 = vtanh.f32 %v662_v11 }
  0xee   : > { %v1780_v60 = vpop.eup %1779  ;;  %v695_v62 = vmul.f32 %v1778_v58, %v2110_v44  ;;  %1805 = vtanh.f32 %v668_v22 }
  0xef   : > { %v1782_v63 = vpop.eup %1781  ;;  %v703_v0 = vmul.f32 %v1780_v60, %v2110_v44  ;;  %1807 = vtanh.f32 %v660_v25 }
  0xf0   : > { %v1784_v10 = vpop.eup %1783  ;;  %v715_v12 = vsel %vm351_vm0, %v695_v62, 0.0  ;;  %v693_v13 = vmul.f32 %v1782_v63, %v2110_v44  ;;  %v2149_v62 = vsub.s32 7, %v2021_v3  ;;  %v779_v9 = vpop.permute.xlu1 %778 }
  0xf1   : > { %v1786_v15 = vpop.eup %1785  ;;  %v739_v17 = vsel %vm351_vm0, %v703_v0, 0.0  ;;  %716 = vadd.xlane.f32.xlu0 %v715_v12  ;;  %v701_v18 = vmul.f32 %v1784_v10, %v2110_v44  ;;  %v2154_v0 = vsub.s32 6, %v2021_v3  ;;  %v765_v10 = vpop.permute.xlu0 %764 }
  0xf2   : > { %v1788_v20 = vpop.eup %1787  ;;  %740 = vadd.xlane.f32.xlu1 %v739_v17  ;;  %v709_v26 = vsel %vm351_vm0, %v693_v13, 0.0  ;;  %v696_v27 = vmul.f32 %v1786_v15, %v2110_v44  ;;  %v811_v63 = vrot.slane %v2028_v4, %v2149_v62 }
  0xf3   : > { %v733_v21 = vsel %vm351_vm0, %v701_v18, 0.0  ;;  %v704_v23 = vmul.f32 %v1788_v20, %v2110_v44  ;;  %v1790_v24 = vpop.eup %1789 }
  0xf4   : > { %v1792_v28 = vpop.eup %1791  ;;  %v702_v31 = vmul.f32 %v1790_v24, %v2110_v44  ;;  %v718_v33 = vsel %vm351_vm0, %v696_v27, 0.0  ;;  %v786_v11 = vpop.permute.xlu1 %785 }
  0xf5   : > { %710 = vadd.xlane.f32.xlu0 %v709_v26  ;;  %v1794_v29 = vpop.eup %1793  ;;  %v742_v30 = vsel %vm351_vm0, %v704_v23, 0.0  ;;  %v694_v34 = vmul.f32 %v1792_v28, %v2110_v44  ;;  %v793_v12 = vpop.permute.xlu0 %792 }
  0xf6   : > { %734 = vadd.xlane.f32.xlu1 %v733_v21  ;;  %v1796_v32 = vpop.eup %1795  ;;  %v699_v36 = vmul.f32 %v1794_v29, %v2110_v44  ;;  %v736_v37 = vsel %vm351_vm0, %v702_v31, 0.0 }
  0xf7   : > { %v707_v38 = vmul.f32 %v1796_v32, %v2110_v44  ;;  %v1798_v39 = vpop.eup %1797  ;;  %v712_v40 = vsel %vm351_vm0, %v694_v34, 0.0 }
  0xf8   : > { %v1800_v41 = vpop.eup %1799  ;;  %v727_v43 = vsel %vm351_vm0, %v699_v36, 0.0  ;;  %v705_v46 = vmul.f32 %v1798_v39, %v2110_v44  ;;  %v800_v13 = vpop.permute.xlu1 %799 }
  0xf9   : > { %719 = vadd.xlane.f32.xlu0 %v718_v33  ;;  %v751_v45 = vsel %vm351_vm0, %v707_v38, 0.0  ;;  %v1802_v47 = vpop.eup %1801  ;;  %v697_v48 = vmul.f32 %v1800_v41, %v2110_v44 }
  0xfa   : > { %743 = vadd.xlane.f32.xlu1 %v742_v30  ;;  %v1804_v49 = vpop.eup %1803  ;;  %v745_v50 = vsel %vm351_vm0, %v705_v46, 0.0  ;;  %v708_v51 = vmul.f32 %v1802_v47, %v2110_v44 }
  0xfb   : > { %v1806_v52 = vpop.eup %1805  ;;  %v721_v53 = vsel %vm351_vm0, %v697_v48, 0.0  ;;  %v700_v54 = vmul.f32 %v1804_v49, %v2110_v44 }
  0xfc   : > { %v1808_v55 = vpop.eup %1807  ;;  %v754_v56 = vsel %vm351_vm0, %v708_v51, 0.0  ;;  %v706_v57 = vmul.f32 %v1806_v52, %v2110_v44 }
  0xfd   : > { %713 = vadd.xlane.f32.xlu0 %v712_v40  ;;  %v730_v58 = vsel %vm351_vm0, %v700_v54, 0.0  ;;  %v698_v59 = vmul.f32 %v1808_v55, %v2110_v44  ;;  %v804_v44 = vrot.slane %v2028_v4, %v2154_v0 }
  0xfe   : > { %737 = vadd.xlane.f32.xlu1 %v736_v37  ;;  %v748_v60 = vsel %vm351_vm0, %v706_v57, 0.0 }
  0xff   : > { %v724_v61 = vsel %vm351_vm0, %v698_v59, 0.0 }
 0x101   : > { %728 = vadd.xlane.f32.xlu0 %v727_v43 }
 0x102   : > { %752 = vadd.xlane.f32.xlu1 %v751_v45 }
 0x105   : > { %722 = vadd.xlane.f32.xlu0 %v721_v53 }
 0x106   : > { %746 = vadd.xlane.f32.xlu1 %v745_v50 }
 0x109   : > { %731 = vadd.xlane.f32.xlu0 %v730_v58 }
 0x10a   : > { %755 = vadd.xlane.f32.xlu1 %v754_v56  ;;  %v904_v56 = vand.u32 127, %v481_v1 }
 0x10c   : > { %v2208_v59 = vsub.s32 %v904_v56, %v2021_v3 }
 0x10d   : > { %725 = vadd.xlane.f32.xlu0 %v724_v61 }
 0x10e   : > { %749 = vadd.xlane.f32.xlu1 %v748_v60 }
 0x11f   : > { %813 = vbcast.lane.b32.xlu1 %v811_v63, 256 }
 0x123   : > { %806 = vbcast.lane.b32.xlu0 %v804_v44, 256 }
 0x17a   : > { %v717_v14 = vpop.xlane.xlu0 %716 }
 0x17b   : > { %v741_v15 = vpop.xlane.xlu1 %740  ;;  %v2158_v16 = vmul.f32 %v779_v9, %v717_v14 }
 0x17c   : > { %v2160_v17 = vmul.f32 %v779_v9, %v741_v15 }
 0x17d   : > { %862 = vperm.xlu1 %1771, %v2158_v16  }
 0x17e   : > { %886 = vperm.xlu0 %1772, %v2160_v17   ;;  %v711_v18 = vpop.xlane.xlu0 %710 }
 0x17f   : > { %v735_v20 = vpop.xlane.xlu1 %734  ;;  %v2164_v4 = vmul.f32 %v765_v10, %v711_v18 }
 0x180   : > { %v2166_v21 = vmul.f32 %v765_v10, %v735_v20 }
 0x182   : > { %880 = vperm.xlu1 %1771, %v2166_v21   ;;  %856 = vperm.xlu0 %1772, %v2164_v4   ;;  %v720_v22 = vpop.xlane.xlu0 %719 }
 0x183   : > { %v744_v23 = vpop.xlane.xlu1 %743  ;;  %v2170_v24 = vmul.f32 %v786_v11, %v720_v22 }
 0x184   : > { %v2172_v25 = vmul.f32 %v786_v11, %v744_v23 }
 0x186   : > { %865 = vperm.xlu1 %1771, %v2170_v24   ;;  %889 = vperm.xlu0 %1772, %v2172_v25   ;;  %v714_v26 = vpop.xlane.xlu0 %713 }
 0x187   : > { %v738_v27 = vpop.xlane.xlu1 %737  ;;  %v2176_v28 = vmul.f32 %v772_v2, %v714_v26 }
 0x188   : > { %v2178_v29 = vmul.f32 %v772_v2, %v738_v27 }
 0x18a   : > { %859 = vperm.xlu1 %1771, %v2176_v28   ;;  %883 = vperm.xlu0 %1772, %v2178_v29   ;;  %v729_v30 = vpop.xlane.xlu0 %728 }
 0x18b   : > { %v753_v31 = vpop.xlane.xlu1 %752 }
 0x18e   : > { %v723_v32 = vpop.xlane.xlu0 %722 }
 0x18f   : > { %v747_v33 = vpop.xlane.xlu1 %746  ;;  %v2190_v43 = vmul.f32 %v793_v12, %v723_v32 }
 0x190   : > { %v2188_v42 = vmul.f32 %v793_v12, %v747_v33 }
 0x192   : > { %v732_v34 = vpop.xlane.xlu0 %731 }
 0x193   : > { %v756_v37 = vpop.xlane.xlu1 %755 }
 0x196   : > { %v726_v36 = vpop.xlane.xlu0 %725 }
 0x197   : > { %v750_v41 = vpop.xlane.xlu1 %749  ;;  %v2196_v46 = vmul.f32 %v800_v13, %v726_v36 }
 0x198   : > { %v2194_v45 = vmul.f32 %v800_v13, %v750_v41 }
 0x19a   : > { %v807_v38 = vpop.permute.xlu0 %806 }
 0x19b   : > { %v2182_v39 = vmul.f32 %v807_v38, %v729_v30  ;;  %v2184_v40 = vmul.f32 %v807_v38, %v753_v31  ;;  %v814_v47 = vpop.permute.xlu1 %813 }
 0x19c   : > { %v2200_v48 = vmul.f32 %v814_v47, %v732_v34  ;;  %v2202_v49 = vmul.f32 %v814_v47, %v756_v37 }
 0x19d   : > { %898 = vperm.xlu0 %1772, %v2184_v40   ;;  %874 = vperm.xlu1 %1771, %v2182_v39  }
 0x1a1   : > { %892 = vperm.xlu0 %1772, %v2188_v42   ;;  %868 = vperm.xlu1 %1771, %v2190_v43  }
 0x1a5   : > { %895 = vperm.xlu0 %1772, %v2194_v45   ;;  %871 = vperm.xlu1 %1771, %v2196_v46  }
 0x1a9   : > { %901 = vperm.xlu0 %1772, %v2202_v49   ;;  %877 = vperm.xlu1 %1771, %v2200_v48  }
 0x1f8   : > { %v863_v50 = vpop.permute.xlu1 %862 }
 0x1f9   : > { %v887_v51 = vpop.permute.xlu0 %886  ;;  %v916_v11 = vrot.slane %v863_v50, %v2208_v59 }
 0x1fa   : > { %v948_v3 = vrot.slane %v887_v51, %v2208_v59 }
 0x1fd   : > { %v881_v52 = vpop.permute.xlu1 %880  ;;  %v857_v53 = vpop.permute.xlu0 %856 }
 0x1fe   : > { %v940_v2 = vrot.slane %v881_v52, %v2208_v59  ;;  %v908_v9 = vrot.slane %v857_v53, %v2208_v59 }
 0x201   : > { %v866_v54 = vpop.permute.xlu1 %865  ;;  %v890_v55 = vpop.permute.xlu0 %889 }
 0x202   : > { %v920_v22 = vrot.slane %v866_v54, %v2208_v59  ;;  %v952_v23 = vrot.slane %v890_v55, %v2208_v59 }
 0x205   : > { %v860_v57 = vpop.permute.xlu1 %859  ;;  %v884_v58 = vpop.permute.xlu0 %883 }
 0x206   : > { %v912_v60 = vrot.slane %v860_v57, %v2208_v59  ;;  %v944_v61 = vrot.slane %v884_v58, %v2208_v59 }
 0x208   : > { %v970_v10 = vsel %vm969_vm1, %v912_v60, %v908_v9  ;;  %v983_v1 = vsel %vm969_vm1, %v944_v61, %v940_v2 }
 0x209   : > { %v972_v14 = vsel %vm971_vm2, %v916_v11, %v970_v10  ;;  %v984_v15 = vsel %vm971_vm2, %v948_v3, %v983_v1 }
 0x20a   : > { %v974_v30 = vsel %vm973_vm3, %v920_v22, %v972_v14  ;;  %v985_v31 = vsel %vm973_vm3, %v952_v23, %v984_v15 }
 0x218   : > { %v875_v63 = vpop.permute.xlu1 %874  ;;  %v899_v44 = vpop.permute.xlu0 %898 }
 0x219   : > { %v932_v41 = vrot.slane %v875_v63, %v2208_v59  ;;  %v964_v47 = vrot.slane %v899_v44, %v2208_v59 }
 0x21c   : > { %v869_v12 = vpop.permute.xlu1 %868  ;;  %v893_v13 = vpop.permute.xlu0 %892 }
 0x21d   : > { %v924_v18 = vrot.slane %v869_v12, %v2208_v59  ;;  %v956_v20 = vrot.slane %v893_v13, %v2208_v59 }
 0x21f   : > { %v976_v34 = vsel %vm975_vm4, %v924_v18, %v974_v30  ;;  %v986_v36 = vsel %vm975_vm4, %v956_v20, %v985_v31 }
 0x220   : > { %v872_v26 = vpop.permute.xlu1 %871  ;;  %v896_v27 = vpop.permute.xlu0 %895 }
 0x221   : > { %v928_v32 = vrot.slane %v872_v26, %v2208_v59  ;;  %v960_v33 = vrot.slane %v896_v27, %v2208_v59 }
 0x223   : > { %v978_v37 = vsel %vm977_vm5, %v928_v32, %v976_v34  ;;  %v987_v38 = vsel %vm977_vm5, %v960_v33, %v986_v36 }
 0x224   : > { %v878_v50 = vpop.permute.xlu1 %877  ;;  %v902_v51 = vpop.permute.xlu0 %901  ;;  %v980_v54 = vsel %vm979_vm6, %v932_v41, %v978_v37  ;;  %v988_v55 = vsel %vm979_vm6, %v964_v47, %v987_v38 }
 0x225   : > { %v936_v52 = vrot.slane %v878_v50, %v2208_v59  ;;  %v968_v53 = vrot.slane %v902_v51, %v2208_v59 }
 0x227   : > { %v982_v56 = vsel %vm981_vm7, %v936_v52, %v980_v54  ;;  %v989_v57 = vsel %vm981_vm7, %v968_v53, %v988_v55 }
 0x228   : > { %v993_v58 = vsel %vm992_vm8, %v982_v56, -inf  ;;  %v996_v60 = vsel %vm992_vm8, %v989_v57, -inf }
 0x229   : > { %994 = vmax.xlane.f32.xlu1 %v993_v58  ;;  %997 = vmax.xlane.f32.xlu0 %v996_v60 }
 0x2b2   : > { %v2242_v61 = vpop.xlane.xlu1 %994  ;;  %v2248_v2 = vpop.xlane.xlu0 %997 }
 0x2b3   : > { %v1004_v63 = vrot.slane %v2242_v61, %v2034_v6  ;;  %v1008_v44 = vrot.slane %v2242_v61, %v2031_v5  ;;  %v1036_v3 = vrot.slane %v2248_v2, %v2034_v6  ;;  %v1040_v12 = vrot.slane %v2248_v2, %v2031_v5 }
 0x2b4   : > { %v1012_v13 = vrot.slane %v2242_v61, %v2037_v7  ;;  %v1044_v14 = vrot.slane %v2248_v2, %v2037_v7  ;;  %v1016_v15 = vrot.slane %v2242_v61, %v2061_v19  ;;  %v1048_v20 = vrot.slane %v2248_v2, %v2061_v19 }
 0x2b5   : > { %v1081_v9 = vsub.f32 %v2164_v4, %v1004_v63  ;;  %v1082_v10 = vsub.f32 %v2176_v28, %v1008_v44  ;;  %v1089_v4 = vsub.f32 %v2166_v21, %v1036_v3  ;;  %v1090_v28 = vsub.f32 %v2178_v29, %v1040_v12 }
 0x2b6   : > { %v1083_v18 = vsub.f32 %v2158_v16, %v1012_v13  ;;  %v1091_v22 = vsub.f32 %v2160_v17, %v1044_v14  ;;  %v1020_v27 = vrot.slane %v2242_v61, %v2041_v8  ;;  %v1084_v30 = vsub.f32 %v2170_v24, %v1016_v15 }
 0x2b7   : > { %v1097_v1 = vmul.f32 1.442695, %v1081_v9  ;;  %v1099_v11 = vmul.f32 1.442695, %v1082_v10  ;;  %v1113_v23 = vmul.f32 1.442695, %v1089_v4  ;;  %v1052_v29 = vrot.slane %v2248_v2, %v2041_v8 }
 0x2b8   : > { %v1115_v26 = vmul.f32 1.442695, %v1090_v28  ;;  %v1101_v21 = vmul.f32 1.442695, %v1083_v18  ;;  %v1092_v31 = vsub.f32 %v2172_v25, %v1048_v20  ;;  %v1117_v16 = vmul.f32 1.442695, %v1091_v22 }
 0x2b9   : > { %1809 = vpow2.f32 %v1097_v1  ;;  %v1024_v32 = vrot.slane %v2242_v61, %v2080_v35  ;;  %v1085_v17 = vsub.f32 %v2190_v43, %v1020_v27  ;;  %v1103_v33 = vmul.f32 1.442695, %v1084_v30 }
 0x2ba   : > { %1811 = vpow2.f32 %v1099_v11  ;;  %v1056_v24 = vrot.slane %v2248_v2, %v2080_v35  ;;  %v1093_v36 = vsub.f32 %v2188_v42, %v1052_v29  ;;  %v1119_v37 = vmul.f32 1.442695, %v1092_v31 }
 0x2bb   : > { %1813 = vpow2.f32 %v1113_v23  ;;  %v1028_v25 = vrot.slane %v2242_v61, %v2154_v0  ;;  %v1086_v43 = vsub.f32 %v2196_v46, %v1024_v32  ;;  %v1105_v41 = vmul.f32 1.442695, %v1085_v17 }
 0x2bc   : > { %1815 = vpow2.f32 %v1115_v26  ;;  %v1060_v47 = vrot.slane %v2248_v2, %v2154_v0  ;;  %v1094_v42 = vsub.f32 %v2194_v45, %v1056_v24  ;;  %v1121_v50 = vmul.f32 1.442695, %v1093_v36 }
 0x2bd   : > { %1817 = vpow2.f32 %v1101_v21  ;;  %v1032_v51 = vrot.slane %v2242_v61, %v2149_v62  ;;  %v1087_v52 = vsub.f32 %v2182_v39, %v1028_v25  ;;  %v1107_v53 = vmul.f32 1.442695, %v1086_v43 }
 0x2be   : > { %1819 = vpow2.f32 %v1117_v16  ;;  %v1064_v46 = vrot.slane %v2248_v2, %v2149_v62  ;;  %v1095_v55 = vsub.f32 %v2184_v40, %v1060_v47  ;;  %v1123_v56 = vmul.f32 1.442695, %v1094_v42 }
 0x2bf   : > { %1821 = vpow2.f32 %v1103_v33  ;;  %v1088_v45 = vsub.f32 %v2200_v48, %v1032_v51  ;;  %v1109_v39 = vmul.f32 1.442695, %v1087_v52 }
 0x2c0   : > { %1823 = vpow2.f32 %v1119_v37  ;;  %v1096_v60 = vsub.f32 %v2202_v49, %v1064_v46  ;;  %v1125_v61 = vmul.f32 1.442695, %v1095_v55 }
 0x2c1   : > { %1825 = vpow2.f32 %v1105_v41  ;;  %v1111_v40 = vmul.f32 1.442695, %v1088_v45 }
 0x2c2   : > { %1827 = vpow2.f32 %v1121_v50  ;;  %v1127_v48 = vmul.f32 1.442695, %v1096_v60 }
 0x2c3   : > { %1829 = vpow2.f32 %v1107_v53 }
 0x2c4   : > { %1831 = vpow2.f32 %v1123_v56 }
 0x2c5   : > { %1833 = vpow2.f32 %v1109_v39 }
 0x2c6   : > { %v2277_v34 = vpop.eup %1809  ;;  %1835 = vpow2.f32 %v1125_v61 }
 0x2c7   : > { %v2282_v38 = vpop.eup %1811  ;;  %1146 = vperm.xlu0 %1772, %v2277_v34   ;;  %1837 = vpow2.f32 %v1111_v40 }
 0x2c8   : > { %1149 = vperm.xlu1 %1771, %v2282_v38   ;;  %v2295_v54 = vpop.eup %1813  ;;  %1839 = vpow2.f32 %v1127_v48 }
 0x2c9   : > { %v2300_v57 = vpop.eup %1815 }
 0x2ca   : > { %v2305_v58 = vpop.eup %1817 }
 0x2cb   : > { %1173 = vperm.xlu0 %1772, %v2300_v57   ;;  %v2308_v63 = vpop.eup %1819 }
 0x2cc   : > { %1170 = vperm.xlu1 %1771, %v2295_v54   ;;  %v2312_v44 = vpop.eup %1821 }
 0x2cd   : > { %v2314_v2 = vpop.eup %1823 }
 0x2ce   : > { %v2318_v49 = vpop.eup %1825 }
 0x2cf   : > { %1176 = vperm.xlu0 %1772, %v2308_v63   ;;  %v2320_v9 = vpop.eup %1827 }
 0x2d0   : > { %1152 = vperm.xlu1 %1771, %v2305_v58   ;;  %v2324_v10 = vpop.eup %1829 }
 0x2d1   : > { %v2326_v1 = vpop.eup %1831 }
 0x2d2   : > { %v2330_v11 = vpop.eup %1833 }
 0x2d3   : > { %1179 = vperm.xlu0 %1772, %v2314_v2   ;;  %v2332_v3 = vpop.eup %1835 }
 0x2d4   : > { %1155 = vperm.xlu1 %1771, %v2312_v44   ;;  %v2336_v12 = vpop.eup %1837 }
 0x2d5   : > { %v2338_v13 = vpop.eup %1839 }
 0x2d7   : > { %1182 = vperm.xlu0 %1772, %v2320_v9  }
 0x2d8   : > { %1158 = vperm.xlu1 %1771, %v2318_v49  }
 0x2db   : > { %1185 = vperm.xlu0 %1772, %v2326_v1  }
 0x2dc   : > { %1161 = vperm.xlu1 %1771, %v2324_v10  }
 0x2df   : > { %1188 = vperm.xlu0 %1772, %v2332_v3  }
 0x2e0   : > { %1164 = vperm.xlu1 %1771, %v2330_v11  }
 0x2e3   : > { %1191 = vperm.xlu0 %1772, %v2338_v13  }
 0x2e4   : > { %1167 = vperm.xlu1 %1771, %v2336_v12  }
 0x342   : > { %v1147_v4 = vpop.permute.xlu0 %1146 }
 0x343   : > { %v1150_v14 = vpop.permute.xlu1 %1149  ;;  %v1196_v29 = vrot.slane %v1147_v4, %v2208_v59 }
 0x344   : > { %v1200_v21 = vrot.slane %v1150_v14, %v2208_v59 }
 0x346   : > { %v1174_v15 = vpop.permute.xlu0 %1173  ;;  %v1257_v43 = vsel %vm969_vm1, %v1200_v21, %v1196_v29 }
 0x347   : > { %v1171_v28 = vpop.permute.xlu1 %1170  ;;  %v1232_v32 = vrot.slane %v1174_v15, %v2208_v59 }
 0x348   : > { %v1228_v16 = vrot.slane %v1171_v28, %v2208_v59 }
 0x34a   : > { %v1177_v20 = vpop.permute.xlu0 %1176  ;;  %v1264_v50 = vsel %vm969_vm1, %v1232_v32, %v1228_v16 }
 0x34b   : > { %v1153_v18 = vpop.permute.xlu1 %1152  ;;  %v1236_v33 = vrot.slane %v1177_v20, %v2208_v59 }
 0x34c   : > { %v1204_v17 = vrot.slane %v1153_v18, %v2208_v59 }
 0x34d   : > { %v1265_v46 = vsel %vm971_vm2, %v1236_v33, %v1264_v50 }
 0x34e   : > { %v1180_v23 = vpop.permute.xlu0 %1179  ;;  %v1258_v51 = vsel %vm971_vm2, %v1204_v17, %v1257_v43 }
 0x34f   : > { %v1156_v22 = vpop.permute.xlu1 %1155  ;;  %v1240_v36 = vrot.slane %v1180_v23, %v2208_v59 }
 0x350   : > { %v1208_v24 = vrot.slane %v1156_v22, %v2208_v59 }
 0x351   : > { %v1266_v45 = vsel %vm973_vm3, %v1240_v36, %v1265_v46 }
 0x352   : > { %v1183_v27 = vpop.permute.xlu0 %1182  ;;  %v1259_v55 = vsel %vm973_vm3, %v1208_v24, %v1258_v51 }
 0x353   : > { %v1159_v26 = vpop.permute.xlu1 %1158  ;;  %v1244_v41 = vrot.slane %v1183_v27, %v2208_v59 }
 0x354   : > { %v1212_v37 = vrot.slane %v1159_v26, %v2208_v59 }
 0x355   : > { %v1267_v61 = vsel %vm975_vm4, %v1244_v41, %v1266_v45 }
 0x356   : > { %v1186_v31 = vpop.permute.xlu0 %1185  ;;  %v1260_v39 = vsel %vm975_vm4, %v1212_v37, %v1259_v55 }
 0x357   : > { %v1162_v30 = vpop.permute.xlu1 %1161  ;;  %v1248_v52 = vrot.slane %v1186_v31, %v2208_v59 }
 0x358   : > { %v1216_v47 = vrot.slane %v1162_v30, %v2208_v59 }
 0x359   : > { %v1268_v4 = vsel %vm977_vm5, %v1248_v52, %v1267_v61 }
 0x35a   : > { %v1189_v42 = vpop.permute.xlu0 %1188  ;;  %v1261_v40 = vsel %vm977_vm5, %v1216_v47, %v1260_v39 }
 0x35b   : > { %v1165_v25 = vpop.permute.xlu1 %1164  ;;  %v1252_v56 = vrot.slane %v1189_v42, %v2208_v59 }
 0x35c   : > { %v1220_v53 = vrot.slane %v1165_v25, %v2208_v59 }
 0x35d   : > { %v1269_v20 = vsel %vm979_vm6, %v1252_v56, %v1268_v4 }
 0x35e   : > { %v1192_v14 = vpop.permute.xlu0 %1191  ;;  %v1262_v15 = vsel %vm979_vm6, %v1220_v53, %v1261_v40 }
 0x35f   : > { %v1168_v60 = vpop.permute.xlu1 %1167  ;;  %v1256_v28 = vrot.slane %v1192_v14, %v2208_v59 }
 0x360   : > { %v1224_v48 = vrot.slane %v1168_v60, %v2208_v59 }
 0x361   : > { %v1270_v23 = vsel %vm981_vm7, %v1256_v28, %v1269_v20 }
 0x362   : > { %v1263_v18 = vsel %vm981_vm7, %v1224_v48, %v1262_v15  ;;  %v1276_v26 = vsel %vm992_vm8, %v1270_v23, 0.0 }
 0x363   : > { %v1273_v22 = vsel %vm992_vm8, %v1263_v18, 0.0  ;;  %1277 = vadd.xlane.f32.xlu0 %v1276_v26 }
 0x364   : > { %1274 = vadd.xlane.f32.xlu1 %v1273_v22 }
 0x3ec   : > { %v1278_v30 = vpop.xlane.xlu0 %1277 }
 0x3ed   : > { %v1275_v27 = vpop.xlane.xlu1 %1274 }
 0x3ee   : > { %1841 = vrcp.f32 %v1275_v27 }
 0x3ef   : > { %1843 = vrcp.f32 %v1278_v30 }
 0x3fb   : > { %v1842_v21 = vpop.eup %1841 }
 0x3fc   : > { %v1844_v29 = vpop.eup %1843  ;;  %v1290_v31 = vrot.slane %v1842_v21, %v2031_v5  ;;  %v1286_v16 = vrot.slane %v1842_v21, %v2034_v6  ;;  %v1294_v43 = vrot.slane %v1842_v21, %v2037_v7 }
 0x3fd   : > { %v1322_v33 = vrot.slane %v1844_v29, %v2031_v5  ;;  %v1318_v24 = vrot.slane %v1844_v29, %v2034_v6  ;;  %v1326_v25 = vrot.slane %v1844_v29, %v2037_v7  ;;  %v1330_v5 = vrot.slane %v1844_v29, %v2061_v19 }
 0x3fe   : > { %v1364_v32 = vmul.f32 %v2282_v38, %v1290_v31  ;;  %v1363_v17 = vmul.f32 %v2277_v34, %v1286_v16  ;;  %v1365_v34 = vmul.f32 %v2305_v58, %v1294_v43  ;;  %v1298_v6 = vrot.slane %v1842_v21, %v2061_v19 }
 0x3ff   : > { %v1372_v36 = vmul.f32 %v2300_v57, %v1322_v33  ;;  %v1371_v37 = vmul.f32 %v2295_v54, %v1318_v24  ;;  %v1373_v38 = vmul.f32 %v2308_v63, %v1326_v25  ;;  %v1374_v57 = vmul.f32 %v2314_v2, %v1330_v5 }
 0x400   : > { %1399 = vperm.xlu1 %1771, %v1364_v32   ;;  %1396 = vperm.xlu0 %1772, %v1363_v17   ;;  %v1366_v54 = vmul.f32 %v2312_v44, %v1298_v6  ;;  %v1334_v41 = vrot.slane %v1844_v29, %v2041_v8  ;;  %v1302_v7 = vrot.slane %v1842_v21, %v2041_v8 }
 0x401   : > { %v1338_v47 = vrot.slane %v1844_v29, %v2080_v35  ;;  %v1306_v19 = vrot.slane %v1842_v21, %v2080_v35  ;;  %v1342_v42 = vrot.slane %v1844_v29, %v2154_v0  ;;  %v1310_v8 = vrot.slane %v1842_v21, %v2154_v0 }
 0x402   : > { %v1375_v63 = vmul.f32 %v2320_v9, %v1334_v41  ;;  %v1367_v58 = vmul.f32 %v2318_v49, %v1302_v7  ;;  %v1346_v50 = vrot.slane %v1844_v29, %v2149_v62  ;;  %v1314_v35 = vrot.slane %v1842_v21, %v2149_v62 }
 0x403   : > { %v1376_v2 = vmul.f32 %v2326_v1, %v1338_v47  ;;  %v1368_v44 = vmul.f32 %v2324_v10, %v1306_v19  ;;  %v1377_v9 = vmul.f32 %v2332_v3, %v1342_v42  ;;  %v1369_v49 = vmul.f32 %v2330_v11, %v1310_v8 }
 0x404   : > { %1423 = vperm.xlu0 %1772, %v1372_v36   ;;  %1420 = vperm.xlu1 %1771, %v1371_v37   ;;  %v1378_v1 = vmul.f32 %v2338_v13, %v1346_v50  ;;  %v1370_v10 = vmul.f32 %v2336_v12, %v1314_v35 }
 0x408   : > { %1426 = vperm.xlu0 %1772, %v1373_v38   ;;  %1402 = vperm.xlu1 %1771, %v1365_v34  }
 0x40c   : > { %1429 = vperm.xlu0 %1772, %v1374_v57   ;;  %1405 = vperm.xlu1 %1771, %v1366_v54  }
 0x410   : > { %1432 = vperm.xlu0 %1772, %v1375_v63   ;;  %1408 = vperm.xlu1 %1771, %v1367_v58  }
 0x414   : > { %1435 = vperm.xlu0 %1772, %v1376_v2   ;;  %1411 = vperm.xlu1 %1771, %v1368_v44  }
 0x418   : > { %1438 = vperm.xlu0 %1772, %v1377_v9   ;;  %1414 = vperm.xlu1 %1771, %v1369_v49  }
 0x41c   : > { %1441 = vperm.xlu0 %1772, %v1378_v1   ;;  %1417 = vperm.xlu1 %1771, %v1370_v10  }
 0x47b   : > { %v1400_v0 = vpop.permute.xlu1 %1399  ;;  %v1397_v51 = vpop.permute.xlu0 %1396 }
 0x47c   : > { %v1450_v12 = vrot.slane %v1400_v0, %v2208_v59  ;;  %v1446_v13 = vrot.slane %v1397_v51, %v2208_v59 }
 0x47e   : > { %v1507_v22 = vsel %vm969_vm1, %v1450_v12, %v1446_v13 }
 0x47f   : > { %v1421_v52 = vpop.permute.xlu1 %1420  ;;  %v1424_v3 = vpop.permute.xlu0 %1423 }
 0x480   : > { %v1478_v60 = vrot.slane %v1421_v52, %v2208_v59  ;;  %v1482_v61 = vrot.slane %v1424_v3, %v2208_v59 }
 0x482   : > { %v1514_v23 = vsel %vm969_vm1, %v1482_v61, %v1478_v60 }
 0x483   : > { %v1403_v53 = vpop.permute.xlu1 %1402  ;;  %v1427_v11 = vpop.permute.xlu0 %1426 }
 0x484   : > { %v1454_v40 = vrot.slane %v1403_v53, %v2208_v59  ;;  %v1486_v48 = vrot.slane %v1427_v11, %v2208_v59 }
 0x486   : > { %v1508_v30 = vsel %vm971_vm2, %v1454_v40, %v1507_v22  ;;  %v1515_v21 = vsel %vm971_vm2, %v1486_v48, %v1514_v23 }
 0x487   : > { %v1406_v46 = vpop.permute.xlu1 %1405  ;;  %v1430_v55 = vpop.permute.xlu0 %1429 }
 0x488   : > { %v1458_v14 = vrot.slane %v1406_v46, %v2208_v59  ;;  %v1490_v4 = vrot.slane %v1430_v55, %v2208_v59 }
 0x48a   : > { %v1509_v16 = vsel %vm973_vm3, %v1458_v14, %v1508_v30  ;;  %v1516_v32 = vsel %vm973_vm3, %v1490_v4, %v1515_v21 }
 0x48b   : > { %v1409_v56 = vpop.permute.xlu1 %1408  ;;  %v1433_v62 = vpop.permute.xlu0 %1432 }
 0x48c   : > { %v1462_v28 = vrot.slane %v1409_v56, %v2208_v59  ;;  %v1494_v15 = vrot.slane %v1433_v62, %v2208_v59 }
 0x48e   : > { %v1510_v17 = vsel %vm975_vm4, %v1462_v28, %v1509_v16  ;;  %v1517_v33 = vsel %vm975_vm4, %v1494_v15, %v1516_v32 }
 0x48f   : > { %v1412_v45 = vpop.permute.xlu1 %1411  ;;  %v1436_v39 = vpop.permute.xlu0 %1435 }
 0x490   : > { %v1466_v26 = vrot.slane %v1412_v45, %v2208_v59  ;;  %v1498_v27 = vrot.slane %v1436_v39, %v2208_v59 }
 0x492   : > { %v1511_v37 = vsel %vm977_vm5, %v1466_v26, %v1510_v17  ;;  %v1518_v25 = vsel %vm977_vm5, %v1498_v27, %v1517_v33 }
 0x493   : > { %v1415_v18 = vpop.permute.xlu1 %1414  ;;  %v1439_v20 = vpop.permute.xlu0 %1438 }
 0x494   : > { %v1470_v29 = vrot.slane %v1415_v18, %v2208_v59  ;;  %v1502_v31 = vrot.slane %v1439_v20, %v2208_v59 }
 0x496   : > { %v1512_v34 = vsel %vm979_vm6, %v1470_v29, %v1511_v37  ;;  %v1519_v5 = vsel %vm979_vm6, %v1502_v31, %v1518_v25 }
 0x497   : > { %v1418_v24 = vpop.permute.xlu1 %1417  ;;  %v1442_v36 = vpop.permute.xlu0 %1441 }
 0x498   : > { %v1474_v43 = vrot.slane %v1418_v24, %v2208_v59  ;;  %v1506_v38 = vrot.slane %v1442_v36, %v2208_v59 }
 0x49a   : > { %v1513_v6 = vsel %vm981_vm7, %v1474_v43, %v1512_v34  ;;  %v1520_v57 = vsel %vm981_vm7, %v1506_v38, %v1519_v5 }
 0x49b   : > { %1523 = vst.msk [vmem:[%s282_s11] sm:$0xff] %vm992_vm8, %v1513_v6  ;;  %1524 = vst.msk [vmem:[%s282_s11 + $0x8] sm:$0xff] %vm992_vm8, %v1520_v57 }
 0x49c   : > { %1858 = shalt.err (!%p1855_p5)
}
 0x49d   : > { %s1859_s29 = scalar_lea.hbm %s2439_s15, 256  ;;  %s1863_s9 = scalar_lea.hbm %s2501_s5, 1024 }
 0x49e   : > { %p1860_p6 = scmp.ne.s32.totalorder %s2439_s15, %s1859_s29  ;;  %p1864_p10 = scmp.lt.s32.totalorder %s2439_s15, %s2501_s5 }
 0x49f   : > { %p1865_p11 = scmp.lt.s32.totalorder %s1863_s9, %s1859_s29 }
 0x4a0   : > { %p1861_p7 = pnand %p1860_p6, %p1998_p4 }
 0x4a1   : > { %p1866_p12 = por %p1865_p11, %p1864_p10 }
 0x4a2   : > { %p1862_p9 = pneg %p1861_p7 }
 0x4a4   : > { %p1867_p13 = pnand %p1866_p12, %p1862_p9 }
 0x4a6   : > { %1870 = shalt.err (!%p1867_p13)
}
 0x4a7   : > { %s1926_s13 = smov 128   ;;  %s1927_s21 = smov 8  }
 0x4a8   : > { %1712 = dma.vmem_to_hbm [thread:$0]  (%p1998_p4), %s2441_s12, 256, %s2439_s15, %s2451_s16, %s1926_s13, %s1926_s13, %s1927_s21  }
 0x4a9 PF: > { %p1718_p0 = scmp.ge.s32.totalorder %s1921_s23, 2  ;;  %s1555_s14 = sand.u32 1, %s1901_s18  }
 0x4aa   : > { %s1556_s17 = scalar_lea.sflag [#allocation3], %s1555_s14 }
 0x4ab   : > { %p1715_p1 = pnand %p1718_p0, %p2005_p8 }
 0x4ad   : > { %p1716_p2 = pneg %p1715_p1 }
 0x4af   : > { %1896 = dma.done.wait (%p1716_p2), %s1556_s17, 256  }
 0x4b0   : > { %1898 = vsyncadd (%p1716_p2), %s1556_s17, 4294967040  ;;  %s18_s23 = sadd.s32 1, %s1921_s23   ;;  %s2504_s18 = smov %s1905_s19 }
 0x4b1   : > { %p15_p3 = scmp.ge.s32.totalorder %s18_s23, 6   ;;  %s2505_s19 = smov %s1909_s20 }
 0x4b2   : > { %s2506_s20 = smov %s2011_s6  ;;  %s2507_s21 = smov %s1917_s22 }
 0x4b3   : > { %s2508_s22 = smov %s2510_s26  ;;  %17 = sbr.rel (!%p15_p3) target bundleno = 4 (0x4), region = 81 }
 0x4b8   :  { %1561 = vsyncpa [#allocation3], 1 }
 0x4b9   :  { %1563 = vsyncpa [#allocation3 + $0x1], 1 }

</bundles_post_ra>
